<compile_context>
chip_gen: v7x
topology: tpu7x:2x2x1
jax: 0.10.0
libtpu: 0.0.40
codegen_flags: <defaults>
</compile_context>

<pallas_src>
import functools

import jax
import jax.numpy as jnp
from jax.experimental import pallas as pl
from jax.experimental.pallas import tpu as pltpu


def _round_up(n, m):
    return ((n + m - 1) // m) * m


def prenet_kernel(seed_ref, x_ref, w1_ref, b1_ref, w2_ref, b2_ref, o_ref, *, rate):
    tile_n, hidden = o_ref.shape
    seed = seed_ref[0].astype(jnp.uint32)
    row_off = (pl.program_id(0) * tile_n).astype(jnp.uint32)

    # --- one hash per element -> two 16-bit keep-masks (dropout1 / dropout2) ---
    if rate > 0.0:
        thr16 = jnp.uint32(min(int(rate * (1 << 16)), (1 << 16) - 1))
        rows = jax.lax.broadcasted_iota(jnp.int32, (tile_n, hidden), 0).astype(jnp.uint32)
        cols = jax.lax.broadcasted_iota(jnp.int32, (tile_n, hidden), 1).astype(jnp.uint32)
        v = (rows + row_off) * jnp.uint32(hidden) + cols        # wraps mod 2^32 (see header)
        v = v ^ (seed * jnp.uint32(0x9E3779B9) + jnp.uint32(0x85EBCA6B))
        # lowbias32-style integer mix.
        v = v ^ (v >> 16)
        v = v * jnp.uint32(0x7FEB352D)
        v = v ^ (v >> 15)
        v = v * jnp.uint32(0x846CA68B)
        v = v ^ (v >> 16)
        keep1 = (v & jnp.uint32(0xFFFF)) >= thr16
        keep2 = (v >> 16) >= thr16

    # linear1 (bf16 MXU feed, f32 accumulate) + bias + relu
    h = jnp.dot(x_ref[...].astype(jnp.bfloat16), w1_ref[...],
                preferred_element_type=jnp.float32)
    h = jnp.maximum(h + b1_ref[...], 0.0)

    # dropout1: pure mask (its 1/(1-rate) scale is folded into w2).
    if rate > 0.0:
        h = jnp.where(keep1, h, 0.0)

    # linear2 + bias + relu  (w2/b2 already carry the dropout scales)
    h = jnp.dot(h.astype(jnp.bfloat16), w2_ref[...],
                preferred_element_type=jnp.float32)
    h = jnp.maximum(h + b2_ref[...], 0.0)

    # dropout2: pure mask (its scale is folded into w2/b2).
    if rate > 0.0:
        h = jnp.where(keep2, h, 0.0)

    o_ref[...] = h.astype(o_ref.dtype)


def prenet_forward(x, params, seed, dropout_rate=0.5, tile_n=1024):
    """x: (B, T, input_dim). Returns (B, T, prenet_dim) in x.dtype."""
    w1, b1, w2, b2 = params  # w1: (D, H), b1: (H,), w2: (H, H), b2: (H,)
    B, T, D = x.shape
    H = w1.shape[1]
    N = B * T
    x2 = x.reshape(N, D)                       # free reshape; NO pad, NO extra HBM pass

    # Fold both inverted-dropout scales into the second linear:
    #   w2 *= 1/(1-r)^2  (dropout1 scale ahead of the matmul + dropout2 scale after),
    #   b2 *= 1/(1-r)    (dropout2 scale only; b2 is added after the matmul).
    if dropout_rate > 0.0:
        inv_keep = 1.0 / (1.0 - dropout_rate)
        w2 = w2 * jnp.float32(inv_keep * inv_keep)
        b2 = b2 * jnp.float32(inv_keep)

    # Weights in bf16 (tiny, VMEM-resident); biases stay f32.
    w1 = w1.astype(jnp.bfloat16)
    w2 = w2.astype(jnp.bfloat16)
    b1 = b1.reshape(1, H).astype(jnp.float32)
    b2 = b2.reshape(1, H).astype(jnp.float32)

    # Row tile: multiple of 8, capped at tile_n; force >= 2 tiles when N allows
    # so the "parallel" grid axis can feed both TensorCores on v7x megacore.
    tn = max(8, min(int(tile_n), _round_up(N, 8)))
    if N > 8 and pl.cdiv(N, tn) < 2:
        tn = max(8, _round_up(pl.cdiv(N, 2), 8))
    grid = (pl.cdiv(N, tn),)

    out = pl.pallas_call(
        functools.partial(prenet_kernel, rate=float(dropout_rate)),
        out_shape=jax.ShapeDtypeStruct((N, H), x.dtype),
        grid_spec=pltpu.PrefetchScalarGridSpec(
            num_scalar_prefetch=1,                                 # seed in SMEM
            grid=grid,
            in_specs=[
                pl.BlockSpec((tn, D), lambda i, seed: (i, 0)),     # x rows (streamed, native D)
                pl.BlockSpec((D, H), lambda i, seed: (0, 0)),      # w1 (VMEM-resident, bf16)
                pl.BlockSpec((1, H), lambda i, seed: (0, 0)),      # b1
                pl.BlockSpec((H, H), lambda i, seed: (0, 0)),      # w2 (VMEM-resident, bf16)
                pl.BlockSpec((1, H), lambda i, seed: (0, 0)),      # b2
            ],
            out_specs=pl.BlockSpec((tn, H), lambda i, seed: (i, 0)),
        ),
        compiler_params=pltpu.CompilerParams(
            dimension_semantics=("parallel",)),
    )(
        jnp.asarray([seed], jnp.int32),
        x2, w1, b1, w2, b2,
    )
    return out.reshape(B, T, H)


def init_prenet_params(key, input_dim, prenet_dim):
    """Deterministic nn.Linear-style init: U(-1/sqrt(fan_in), 1/sqrt(fan_in))."""
    k1, k2, k3, k4 = jax.random.split(key, 4)
    lim1 = 1.0 / (input_dim ** 0.5)
    lim2 = 1.0 / (prenet_dim ** 0.5)
    # Stored already transposed: (in_features, out_features).
    w1 = jax.random.uniform(k1, (input_dim, prenet_dim), jnp.float32, -lim1, lim1)
    b1 = jax.random.uniform(k2, (prenet_dim,), jnp.float32, -lim1, lim1)
    w2 = jax.random.uniform(k3, (prenet_dim, prenet_dim), jnp.float32, -lim2, lim2)
    b2 = jax.random.uniform(k4, (prenet_dim,), jnp.float32, -lim2, lim2)
    return w1, b1, w2, b2


if __name__ == "__main__":
    key = jax.random.PRNGKey(0)
    k_x, k_p = jax.random.split(key)

    B, T = 2, 8
    INPUT_DIM, PRENET_DIM = 80, 256   # module defaults

    x = jax.random.normal(k_x, (B, T, INPUT_DIM), jnp.float32)
    params = init_prenet_params(k_p, INPUT_DIM, PRENET_DIM)

    # 1) dropout disabled: check the two linear+relu stages against pure JAX.
    #    (bf16 MXU feed => loose-but-safe tolerance.)
    out_eval = jax.block_until_ready(prenet_forward(x, params, seed=0, dropout_rate=0.0))
    w1, b1, w2, b2 = params
    ref = jnp.maximum(jnp.maximum(x @ w1 + b1, 0.0) @ w2 + b2, 0.0)
    assert out_eval.shape == (B, T, PRENET_DIM)
    assert jnp.allclose(out_eval, ref, atol=2e-2, rtol=2e-2)

    # 2) training-mode forward with dropout (the PyTorch module's default state).
    out = jax.block_until_ready(prenet_forward(x, params, seed=1234, dropout_rate=0.5))
    assert out.shape == (B, T, PRENET_DIM)
    assert out.dtype == jnp.float32
    assert bool(jnp.isfinite(out).all())
    # Roughly rate*(extra) elements zeroed on top of ReLU zeros; sanity-check loosely.
    zero_frac = float(jnp.mean(out == 0.0))
    assert 0.4 < zero_frac < 0.95
    print("KERNEL_OK")
</pallas_src>

<mosaic_0001>
module attributes {stable_mosaic.version = 11 : i64} {
  func.func @prenet_kernel(%arg0: i32, %arg1: memref<1xi32, #tpu.memory_space<smem>>, %arg2: memref<8x80xf32, #tpu.memory_space<vmem>>, %arg3: memref<80x256xbf16, #tpu.memory_space<vmem>>, %arg4: memref<1x256xf32, #tpu.memory_space<vmem>>, %arg5: memref<256x256xbf16, #tpu.memory_space<vmem>>, %arg6: memref<1x256xf32, #tpu.memory_space<vmem>>, %arg7: memref<8x256xf32, #tpu.memory_space<vmem>>) attributes {dimension_semantics = [#tpu.dimension_semantics<parallel>], iteration_bounds = array<i64: 2>, scalar_prefetch = 1 : i64, scratch_operands = 0 : i64, tpu.core_type = #tpu.core_type<tc>, window_params = [{transform_indices = @transform_0, window_bounds = array<i64: 8, 80>}, {pipeline_mode = #tpu.pipeline_mode<synchronous>, transform_indices = @transform_1, window_bounds = array<i64: 80, 256>}, {pipeline_mode = #tpu.pipeline_mode<synchronous>, transform_indices = @transform_2, window_bounds = array<i64: 1, 256>}, {pipeline_mode = #tpu.pipeline_mode<synchronous>, transform_indices = @transform_3, window_bounds = array<i64: 256, 256>}, {pipeline_mode = #tpu.pipeline_mode<synchronous>, transform_indices = @transform_4, window_bounds = array<i64: 1, 256>}, {transform_indices = @transform_5, window_bounds = array<i64: 8, 256>}]} {
    %c0 = arith.constant 0 : index
    %c0_0 = arith.constant 0 : index
    %0 = vector.load %arg2[%c0, %c0_0] : memref<8x80xf32, #tpu.memory_space<vmem>>, vector<8x80xf32>
    %1 = arith.truncf %0 : vector<8x80xf32> to vector<8x80xbf16>
    %c0_1 = arith.constant 0 : index
    %c0_2 = arith.constant 0 : index
    %2 = vector.load %arg3[%c0_1, %c0_2] : memref<80x256xbf16, #tpu.memory_space<vmem>>, vector<80x256xbf16>
    %cst = arith.constant dense<0.000000e+00> : vector<8x256xf32>
    %3 = tpu.matmul %1, %2, %cst {dimension_numbers = #tpu.dot_dimension_numbers<[1], [0], [0], [1], [0, 0, 1, 1], [], []>} : vector<8x80xbf16>, vector<80x256xbf16>, vector<8x256xf32> -> vector<8x256xf32>
    %c0_3 = arith.constant 0 : index
    %c0_4 = arith.constant 0 : index
    %4 = vector.load %arg4[%c0_3, %c0_4] : memref<1x256xf32, #tpu.memory_space<vmem>>, vector<1x256xf32>
    %5 = vector.broadcast %4 : vector<1x256xf32> to vector<8x256xf32>
    %6 = arith.addf %3, %5 : vector<8x256xf32>
    %cst_5 = arith.constant 0.000000e+00 : f32
    %7 = vector.broadcast %cst_5 : f32 to vector<8x256xf32>
    %8 = arith.maximumf %6, %7 : vector<8x256xf32>
    %9 = arith.truncf %8 : vector<8x256xf32> to vector<8x256xbf16>
    %c0_6 = arith.constant 0 : index
    %c0_7 = arith.constant 0 : index
    %10 = vector.load %arg5[%c0_6, %c0_7] : memref<256x256xbf16, #tpu.memory_space<vmem>>, vector<256x256xbf16>
    %cst_8 = arith.constant dense<0.000000e+00> : vector<8x256xf32>
    %11 = tpu.matmul %9, %10, %cst_8 {dimension_numbers = #tpu.dot_dimension_numbers<[1], [0], [0], [1], [0, 0, 1, 1], [], []>} : vector<8x256xbf16>, vector<256x256xbf16>, vector<8x256xf32> -> vector<8x256xf32>
    %c0_9 = arith.constant 0 : index
    %c0_10 = arith.constant 0 : index
    %12 = vector.load %arg6[%c0_9, %c0_10] : memref<1x256xf32, #tpu.memory_space<vmem>>, vector<1x256xf32>
    %13 = vector.broadcast %12 : vector<1x256xf32> to vector<8x256xf32>
    %14 = arith.addf %11, %13 : vector<8x256xf32>
    %cst_11 = arith.constant 0.000000e+00 : f32
    %15 = vector.broadcast %cst_11 : f32 to vector<8x256xf32>
    %16 = arith.maximumf %14, %15 : vector<8x256xf32>
    %c0_12 = arith.constant 0 : index
    %c0_13 = arith.constant 0 : index
    %17 = vector.load %arg7[%c0_12, %c0_13] : memref<8x256xf32, #tpu.memory_space<vmem>>, vector<8x256xf32>
    tpu.vector_store %arg7[%c0_12, %c0_13], %16 {strides = array<i32>} : memref<8x256xf32, #tpu.memory_space<vmem>>, vector<8x256xf32>,
    return
  }
  func.func @transform_0(%arg0: i32, %arg1: memref<1xi32, #tpu.memory_space<smem>>) -> (i32, i32) {
    %c0_i32 = arith.constant 0 : i32
    %c0_i32_0 = arith.constant 0 : i32
    return %arg0, %c0_i32 : i32, i32
  }
  func.func @transform_1(%arg0: i32, %arg1: memref<1xi32, #tpu.memory_space<smem>>) -> (i32, i32) {
    %c0_i32 = arith.constant 0 : i32
    %c0_i32_0 = arith.constant 0 : i32
    %c0_i32_1 = arith.constant 0 : i32
    return %c0_i32, %c0_i32_0 : i32, i32
  }
  func.func @transform_2(%arg0: i32, %arg1: memref<1xi32, #tpu.memory_space<smem>>) -> (i32, i32) {
    %c0_i32 = arith.constant 0 : i32
    %c0_i32_0 = arith.constant 0 : i32
    %c0_i32_1 = arith.constant 0 : i32
    return %c0_i32, %c0_i32_0 : i32, i32
  }
  func.func @transform_3(%arg0: i32, %arg1: memref<1xi32, #tpu.memory_space<smem>>) -> (i32, i32) {
    %c0_i32 = arith.constant 0 : i32
    %c0_i32_0 = arith.constant 0 : i32
    %c0_i32_1 = arith.constant 0 : i32
    return %c0_i32, %c0_i32_0 : i32, i32
  }
  func.func @transform_4(%arg0: i32, %arg1: memref<1xi32, #tpu.memory_space<smem>>) -> (i32, i32) {
    %c0_i32 = arith.constant 0 : i32
    %c0_i32_0 = arith.constant 0 : i32
    %c0_i32_1 = arith.constant 0 : i32
    return %c0_i32, %c0_i32_0 : i32, i32
  }
  func.func @transform_5(%arg0: i32, %arg1: memref<1xi32, #tpu.memory_space<smem>>) -> (i32, i32) {
    %c0_i32 = arith.constant 0 : i32
    %c0_i32_0 = arith.constant 0 : i32
    return %arg0, %c0_i32 : i32, i32
  }
}

</mosaic_0001>

<bundles_post_ra>
// kernel: tpu_custom_call.1
= control target key start
LH: loop header
LB: loop body
LE: loop exit
PB: predicated region body
PF: predicated region fallthrough
CT: control target
= control target key end

     0   :  { %12 = vsyncpa [#allocation5], 0  ;;  %s1381_s0 = inlined_call_operand.<no memory space> [shape: s32[1], index: 0, kind: input, shape index: {}]   ;;  %s1382_s1 = inlined_call_operand.hbm [shape: f32[16,80], index: 1, kind: input, shape index: {}]   ;;  %s1383_s2 = inlined_call_operand.hbm [shape: bf16[80,256], index: 2, kind: input, shape index: {}]   ;;  %s1384_s3 = inlined_call_operand.vmem [shape: f32[1,256], index: 3, kind: input, shape index: {}]   ;;  %s1385_s4 = inlined_call_operand.hbm [shape: bf16[256,256], index: 4, kind: input, shape index: {}]   ;;  %s1386_s5 = inlined_call_operand.vmem [shape: f32[1,256], index: 5, kind: input, shape index: {}]   ;;  %s1387_s6 = inlined_call_operand.hbm [shape: f32[16,256], index: 6, kind: output, shape index: {}]  }
   0x1   :  { %14 = vsyncpa [#allocation5 + $0x1], 0 }
   0x2   :  { %15 = vsyncpa [#allocation8], 0 }
   0x3   :  { %16 = vsyncpa [#allocation6], 0 }
   0x4   :  { %18 = vsyncpa [#allocation6 + $0x1], 0  ;;  %s1142_s0 = smov 0   ;;  %s1144_s21 = smov 0  }
   0x5   :  { %s1146_s22 = smov 0   ;;  %s1148_s23 = smov 0  }
   0x6 LB: > { %s1163_s24 = sadd.s32 4294967295, %s1098_s23   ;;  %s748_s25 = sadd.s32 4294967294, %s1098_s23   ;;  %s1098_s23 = sphi %s1148_s23, %s1407_s23   ;;  %s1094_s22 = sphi %s1146_s22, %s1406_s22   ;;  %s1090_s21 = sphi %s1144_s21, %s1405_s21   ;;  %s1086_s0 = sphi %s1142_s0, %s1404_s0  }
   0x7   : > { %p44_p0 = scmp.ne.s32.totalorder %s1090_s21, %s1086_s0  ;;  %p1388_p1 = scmp.eq.s32.totalorder %s1163_s24, 0 }
   0x8   : > { %p158_p3 = scmp.eq.s32.totalorder %s748_s25, 1  ;;  %p749_p5 = scmp.ge.s32.totalorder %s1098_s23, 1 }
   0x9   : > { %p1172_p4 = por %p1388_p1, %p44_p0  ;;  %p165_p7 = scmp.lt.s32.totalorder %s1098_s23, 3 }
   0xa   : > { %p1177_p6 = por %p158_p3, %p44_p0  ;;  %s1100_s29 = smov [#allocation7]  }
   0xb   : > { %s1391_s26 = scalar_select %p1172_p4, 1, 0 }
   0xc   : > { %s1392_s27 = scalar_select %p1177_p6, 1, 0 }
   0xd   : > { %p1182_p8 = pnand %p749_p5, %p165_p7  ;;  %s177_s30 = sshll.u32 %s1100_s29, 4  ;;  %s1186_s30 = int_to_ptr.vmem [resolvable:$true] %s177_s30 }
   0xe   : > { %s1101_s8 = smov [#allocation9]   ;;  %s942_s12 = scalar_lea.hbm %s1383_s2, 1280 }
   0xf   : > { %p821_p9 = pneg %p1182_p8  ;;  %s193_s9 = sshll.u32 %s1101_s8, 4  ;;  %s1197_s9 = int_to_ptr.vmem [resolvable:$true] %s193_s9 }
  0x10   : > { %p943_p12 = scmp.ne.s32.totalorder %s1383_s2, %s942_s12  ;;  %p949_p5 = scmp.lt.u32.totalorder %s942_s12, %s1383_s2 }
  0x11   : > { %p1193_p11 = pnand %p821_p9, %p1388_p1 }
  0x13   : > { %p944_p13 = pneg %p1193_p11 }
  0x15   : > { %p945_p0 = pnand %p944_p13, %p943_p12 }
  0x17   : > { %p946_p3 = pneg %p945_p0 }
  0x19   : > { %p951_p7 = pnand %p949_p5, %p946_p3 }
  0x1b   : > { %954 = shalt.err (!%p951_p7)
}
  0x1c   : > { %s955_s17 = scalar_lea.vmem %s1186_s30, 1280  ;;  %p963_p2 = scmp.lt.s32.totalorder %s1186_s30, %s1186_s30 }
  0x1d   : > { %p956_p9 = scmp.ne.s32.totalorder %s1186_s30, %s955_s17  ;;  %p964_p12 = scmp.lt.s32.totalorder %s955_s17, %s955_s17 }
  0x1f   : > { %p958_p10 = pnand %p956_p9, %p944_p13  ;;  %p965_p0 = por %p964_p12, %p963_p2 }
  0x21   : > { %p959_p1 = pneg %p958_p10 }
  0x23   : > { %p966_p6 = pnand %p965_p0, %p959_p1 }
  0x25   : > { %969 = shalt.err (!%p966_p6)
}
  0x26   : > { %s1102_s18 = smov 128   ;;  %s1103_s19 = smov 8  }
  0x27   : > { %824 = dma.hbm_to_vmem [thread:$0]  (!%p1193_p11), %s1383_s2, 1280, %s1186_s30, [#allocation8], %s1102_s18, %s1102_s18, %s1103_s19  }
  0x28   : > { %s970_s10 = scalar_lea.hbm %s1385_s4, 4096 }
  0x29   : > { %p971_p2 = scmp.ne.s32.totalorder %s1385_s4, %s970_s10  ;;  %p977_p10 = scmp.lt.u32.totalorder %s970_s10, %s1385_s4 }
  0x2b   : > { %p973_p1 = pnand %p971_p2, %p944_p13 }
  0x2d   : > { %p974_p6 = pneg %p973_p1 }
  0x2f   : > { %p979_p3 = pnand %p977_p10, %p974_p6 }
  0x31   : > { %982 = shalt.err (!%p979_p3)
}
  0x32   : > { %s983_s30 = scalar_lea.vmem %s1197_s9, 4096  ;;  %p991_p12 = scmp.lt.s32.totalorder %s1197_s9, %s1197_s9 }
  0x33   : > { %p984_p5 = scmp.ne.s32.totalorder %s1197_s9, %s983_s30  ;;  %p992_p0 = scmp.lt.s32.totalorder %s983_s30, %s983_s30 }
  0x35   : > { %p986_p7 = pnand %p984_p5, %p944_p13  ;;  %p993_p2 = por %p992_p0, %p991_p12 }
  0x37   : > { %p987_p9 = pneg %p986_p7 }
  0x39   : > { %p994_p1 = pnand %p993_p2, %p987_p9 }
  0x3b   : > { %997 = shalt.err (!%p994_p1)
}
  0x3c   : > { %827 = dma.hbm_to_vmem [thread:$0]  (!%p1193_p11), %s1385_s4, 4096, %s1197_s9, [#allocation8], %s1102_s18, %s1102_s18, %s1103_s19  }
  0x3d   : > { %s1252_s17 = sadd.s32 1, %s1098_s23   ;;  %s31_s7 = sadd.s32 1, %s1094_s22 }
  0x3e   : > { %s28_s20 = ssub.s32 %s1098_s23, %s1252_s17  ;;  %p38_p13 = scmp.ne.s32.totalorder %s1094_s22, %s1090_s21 }
  0x3f   : > { %p29_p6 = scmp.eq.s32.totalorder %s28_s20, 0  ;;  %p39_p10 = scmp.eq.s32.totalorder %s1098_s23, 0 }
  0x40   : > { %p1395_p3 = scmp.eq.s32.totalorder %s1163_s24, 1  ;;  %p838_p7 = scmp.lt.s32.totalorder %s1098_s23, 2 }
  0x41   : > { %s1268_s29 = scalar_select %p29_p6, %s1094_s22, %s31_s7  }
  0x42   : > { %p1262_p5 = por %p1395_p3, %p38_p13  ;;  %p40_p9 = por %p39_p10, %p38_p13 }
  0x43   : > { %s210_s8 = sand.u32 1, %s1094_s22   ;;  %s754_s9 = sshll.u32 %s1098_s23, 7 }
  0x44   : > { %s1396_s25 = scalar_select %p1262_p5, 1, 0 }
  0x45   : > { %s753_s10 = sshll.u32 %s210_s8, 3  ;;  %s1275_s11 = scalar_lea.hbm %s1382_s1, %s754_s9 }
  0x46   : > { %s214_s12 = scalar_lea.vmem [#allocation4], %s753_s10  ;;  %p1279_p11 = pnand %p838_p7, %p40_p9 }
  0x47   : > { %s221_s13 = sshll.u32 %s214_s12, 4  ;;  %s211_s30 = scalar_lea.sflag [#allocation5], %s210_s8  ;;  %s1277_s13 = int_to_ptr.vmem [resolvable:$true] %s221_s13 }
  0x48   : > { %s998_s15 = scalar_lea.hbm %s1275_s11, 128  ;;  %p1000_p0 = pneg %p1279_p11 }
  0x49   : > { %p999_p12 = scmp.ne.s32.totalorder %s1275_s11, %s998_s15  ;;  %s1003_s20 = scalar_lea.hbm %s1382_s1, 256 }
  0x4a   : > { %p1004_p13 = scmp.lt.u32.totalorder %s1275_s11, %s1382_s1  ;;  %p1005_p6 = scmp.lt.u32.totalorder %s1003_s20, %s998_s15 }
  0x4b   : > { %p1001_p2 = pnand %p1000_p0, %p999_p12  ;;  %p1007_p3 = scmp.lt.u32.totalorder %s998_s15, %s1275_s11 }
  0x4c   : > { %p1006_p10 = por %p1005_p6, %p1004_p13 }
  0x4d   : > { %p1002_p1 = pneg %p1001_p2 }
  0x4e   : > { %p1008_p7 = por %p1007_p3, %p1006_p10 }
  0x50   : > { %p1009_p9 = pnand %p1008_p7, %p1002_p1 }
  0x52   : > { %1012 = shalt.err (!%p1009_p9)
}
  0x53   : > { %s1013_s8 = scalar_lea.vmem %s1277_s13, 128  ;;  %s1104_s18 = smov [#allocation4]  }
  0x54   : > { %p1014_p12 = scmp.ne.s32.totalorder %s1277_s13, %s1013_s8  ;;  %s1018_s19 = sshll.u32 %s1104_s18, 4  ;;  %s1019_s19 = int_to_ptr.vmem [resolvable:$false] %s1018_s19 }
  0x55   : > { %s1020_s12 = scalar_lea.vmem %s1019_s19, 256  ;;  %p1021_p4 = scmp.lt.s32.totalorder %s1277_s13, %s1019_s19 }
  0x56   : > { %p1016_p2 = pnand %p1014_p12, %p1000_p0  ;;  %p1022_p13 = scmp.lt.s32.totalorder %s1020_s12, %s1013_s8 }
  0x58   : > { %p1017_p5 = pneg %p1016_p2  ;;  %p1023_p6 = por %p1022_p13, %p1021_p4 }
  0x5a   : > { %p1024_p10 = pnand %p1023_p6, %p1017_p5 }
  0x5c   : > { %1027 = shalt.err (!%p1024_p10)
}
  0x5d   : > { %831 = dma.hbm_to_vmem [thread:$0]  (!%p1279_p11), %s1275_s11, 128, %s1277_s13, %s211_s30  }
  0x5e   : > { %230 = sbr.rel (%p1182_p8) target bundleno = 577 (0x241), region = 40  ;;  %s1311_s15 = sand.u32 (!%p1182_p8), 1, %s1090_s21  }
  0x5f   : > { %s756_s16 = sshll.u32 (!%p1182_p8), %s1311_s15, 3  ;;  %s233_s7 = scalar_lea.sflag (!%p1182_p8), [#allocation5], %s1311_s15 }
  0x60   : > { %s1315_s20 = scalar_lea.vmem (!%p1182_p8), [#allocation4], %s756_s16  ;;  %p1398_p4 = scmp.ne.s32.totalorder (!%p1182_p8), %s1391_s26, 0 }
  0x65   : > { %1073 = dma.done.wait (%p1398_p4), %s233_s7, 128  }
  0x66   : > { %1075 = vsyncadd (%p1398_p4), %s233_s7, 4294967168  ;;  %p1399_p5 = scmp.eq.s32.totalorder %s1163_s24, 0 }
  0x68   : > { %1077 = dma.done.wait (%p1399_p5), [#allocation8], 5376   ;;  %p1400_p8 = pmov %p1399_p5 }
  0x69   : > { %v1105_v0 = vmov 0   ;;  %v879_v1 = vld [vmem:[#allocation7 + $0x4] ss:$8 sps:$4 sm:$0xff]   ;;  %v881_v2 = vld [vmem:[#allocation7] ss:$8 sps:$4 sm:$0xff]   ;;  %v272_v16 = vld [vmem:[%s1315_s20] sm:$0xff]  ;;  %v286_v45 = vlaneseq }
  0x6a   : > { %1079 = vsyncadd (%p1400_p8), [#allocation8], 4294961920  ;;  %382 = vmatprep.mubr.bf16.mxu0 %v1105_v0  ;;  %350 = vmatprep.subr.bf16.mxu0 %v879_v1  ;;  %v882_v3 = vld [vmem:[#allocation7 + $0x14] ss:$8 sps:$4 sm:$0xff]   ;;  %v884_v4 = vld [vmem:[#allocation7 + $0x10] ss:$8 sps:$4 sm:$0xff]   ;;  %v273_v19 = vpack.c.bf16 %v272_v16, %v272_v16 }
  0x6b   : > { %351 = vmatpush1.bf16.msra.mxu0 %v881_v2  ;;  %v885_v5 = vld [vmem:[#allocation7 + $0x24] ss:$8 sps:$4 sm:$0xff]   ;;  %v887_v6 = vld [vmem:[#allocation7 + $0x20] ss:$8 sps:$4 sm:$0xff]   ;;  %v888_v7 = vld [vmem:[#allocation7 + $0x34] ss:$8 sps:$4 sm:$0xff]  }
  0x6c   : > { %352 = vmatprep.subr.bf16.mxu0 %v882_v3  ;;  %v894_v8 = vld [vmem:[#allocation9 + $0x4] ss:$8 sps:$4 sm:$0xff]   ;;  %v896_v9 = vld [vmem:[#allocation9] ss:$8 sps:$4 sm:$0xff]   ;;  %v897_v10 = vld [vmem:[#allocation9 + $0x14] ss:$8 sps:$4 sm:$0xff]  }
  0x6d   : > { %599 = vmatprep.subr.bf16.mxu1 %v894_v8  ;;  %v890_v11 = vld [vmem:[#allocation7 + $0x30] ss:$8 sps:$4 sm:$0xff]   ;;  %v899_v12 = vld [vmem:[#allocation9 + $0x10] ss:$8 sps:$4 sm:$0xff]   ;;  %v900_v13 = vld [vmem:[#allocation9 + $0x24] ss:$8 sps:$4 sm:$0xff]  }
  0x6e   : > { %600 = vmatpush1.bf16.msra.mxu1 %v896_v9  ;;  %v891_v14 = vld [vmem:[#allocation7 + $0x44] ss:$8 sps:$4 sm:$0xff]   ;;  %v893_v15 = vld [vmem:[#allocation7 + $0x40] ss:$8 sps:$4 sm:$0xff]   ;;  %v902_v17 = vld [vmem:[#allocation9 + $0x20] ss:$8 sps:$4 sm:$0xff]  }
  0x6f   : > { %353 = vmatpush1.bf16.msra.mxu0 %v884_v4  ;;  %601 = vmatprep.subr.bf16.mxu1 %v897_v10  ;;  %v903_v18 = vld [vmem:[#allocation9 + $0x34] ss:$8 sps:$4 sm:$0xff]   ;;  %v905_v20 = vld [vmem:[#allocation9 + $0x30] ss:$8 sps:$4 sm:$0xff]   ;;  %vm346_vm0 = vcmask 654336   ;;  %v287_v46 = vshrl.u32 %v286_v45, 7 }
  0x70   : > { %354 = vmatprep.subr.bf16.mxu0 %v885_v5  ;;  %v906_v21 = vld [vmem:[#allocation9 + $0x44] ss:$8 sps:$4 sm:$0xff]   ;;  %v908_v22 = vld [vmem:[#allocation9 + $0x40] ss:$8 sps:$4 sm:$0xff]   ;;  %v909_v23 = vld [vmem:[#allocation9 + $0x54] ss:$8 sps:$4 sm:$0xff]  }
  0x71   : > { %v911_v24 = vld [vmem:[#allocation9 + $0x50] ss:$8 sps:$4 sm:$0xff]   ;;  %v912_v25 = vld [vmem:[#allocation9 + $0x64] ss:$8 sps:$4 sm:$0xff]   ;;  %v914_v26 = vld [vmem:[#allocation9 + $0x60] ss:$8 sps:$4 sm:$0xff]  }
  0x72   : > { %602 = vmatpush1.bf16.msra.mxu1 %v899_v12  ;;  %v915_v27 = vld [vmem:[#allocation9 + $0x74] ss:$8 sps:$4 sm:$0xff]   ;;  %v917_v28 = vld [vmem:[#allocation9 + $0x70] ss:$8 sps:$4 sm:$0xff]   ;;  %v918_v29 = vld [vmem:[#allocation9 + $0x84] ss:$8 sps:$4 sm:$0xff]  }
  0x73   : > { %355 = vmatpush1.bf16.msra.mxu0 %v887_v6  ;;  %603 = vmatprep.subr.bf16.mxu1 %v900_v13  ;;  %v920_v30 = vld [vmem:[#allocation9 + $0x80] ss:$8 sps:$4 sm:$0xff]   ;;  %v921_v31 = vld [vmem:[#allocation9 + $0x94] ss:$8 sps:$4 sm:$0xff]   ;;  %v923_v32 = vld [vmem:[#allocation9 + $0x90] ss:$8 sps:$4 sm:$0xff]  }
  0x74   : > { %356 = vmatprep.subr.bf16.mxu0 %v888_v7  ;;  %v924_v33 = vld [vmem:[#allocation9 + $0xa4] ss:$8 sps:$4 sm:$0xff]   ;;  %v926_v34 = vld [vmem:[#allocation9 + $0xa0] ss:$8 sps:$4 sm:$0xff]   ;;  %v927_v35 = vld [vmem:[#allocation9 + $0xb4] ss:$8 sps:$4 sm:$0xff]  }
  0x75   : > { %v929_v36 = vld [vmem:[#allocation9 + $0xb0] ss:$8 sps:$4 sm:$0xff]   ;;  %v930_v37 = vld [vmem:[#allocation9 + $0xc4] ss:$8 sps:$4 sm:$0xff]   ;;  %v932_v38 = vld [vmem:[#allocation9 + $0xc0] ss:$8 sps:$4 sm:$0xff]  }
  0x76   : > { %604 = vmatpush1.bf16.msra.mxu1 %v902_v17  ;;  %v933_v39 = vld [vmem:[#allocation9 + $0xd4] ss:$8 sps:$4 sm:$0xff]   ;;  %v935_v40 = vld [vmem:[#allocation9 + $0xd0] ss:$8 sps:$4 sm:$0xff]   ;;  %v936_v41 = vld [vmem:[#allocation9 + $0xe4] ss:$8 sps:$4 sm:$0xff]  }
  0x77   : > { %357 = vmatpush1.bf16.msra.mxu0 %v890_v11  ;;  %605 = vmatprep.subr.bf16.mxu1 %v903_v18  ;;  %v938_v42 = vld [vmem:[#allocation9 + $0xe0] ss:$8 sps:$4 sm:$0xff]   ;;  %v939_v43 = vld [vmem:[#allocation9 + $0xf4] ss:$8 sps:$4 sm:$0xff]   ;;  %v941_v44 = vld [vmem:[#allocation9 + $0xf0] ss:$8 sps:$4 sm:$0xff]  }
  0x78   : > { %358 = vmatprep.subr.bf16.mxu0 %v891_v14  ;;  %v288_v47 = vsub.s32 0, %v287_v46  ;;  %v284_v48 = vld [vmem:[%s1384_s3] sm:$0x3]  ;;  %v292_v49 = vsub.s32 1, %v287_v46  ;;  %s759_s14 = sshll.u32 %s1311_s15, 4  ;;  %s808_s30 = sshll.u32 %s1163_s24, 8 }
  0x79   : > { %v427_v62 = vld [vmem:[%s1386_s5] sm:$0x3]  ;;  %s270_s10 = scalar_lea.vmem [#allocation10], %s759_s14  ;;  %s1337_s19 = scalar_lea.hbm %s1387_s6, %s808_s30 }
  0x7a   : > { %606 = vmatpush1.bf16.msra.mxu1 %v905_v20  ;;  %v289_v50 = vrot.slane %v284_v48, %v288_v47  ;;  %v293_v51 = vrot.slane %v284_v48, %v292_v49  ;;  %v432_v63 = vrot.slane %v427_v62, %v288_v47  ;;  %v436_v0 = vrot.slane %v427_v62, %v292_v49  ;;  %s659_s9 = sshll.u32 %s270_s10, 4  ;;  %s645_s24 = scalar_lea.sflag [#allocation6], %s1311_s15  ;;  %s1339_s9 = int_to_ptr.vmem [resolvable:$true] %s659_s9 }
  0x7b   : > { %359 = vmatpush1.bf16.msra.mxu0 %v893_v15  ;;  %607 = vmatprep.subr.bf16.mxu1 %v906_v21  ;;  %s1028_s12 = scalar_lea.vmem %s1339_s9, 256  ;;  %p1401_p0 = scmp.ne.s32.totalorder %s1396_s25, 0 }
  0x7c   : > { %p1029_p11 = scmp.ne.s32.totalorder %s1339_s9, %s1028_s12  ;;  %s1106_s16 = smov [#allocation10]  }
  0x7d   : > { %s1032_s7 = sshll.u32 %s1106_s16, 4  ;;  %s1033_s7 = int_to_ptr.vmem [resolvable:$false] %s1032_s7 }
  0x7e   : > { %770 = vmatmul.mubr.msk.bf16.vlgmr.msra.gmra.mrb[0].mxu0 %vm346_vm0, %v273_v19  ;;  %608 = vmatpush1.bf16.msra.mxu1 %v908_v22  ;;  %p1030_p1 = pnand %p1029_p11, %p1401_p0  ;;  %s1034_s20 = scalar_lea.vmem %s1033_s7, 512 }
  0x7f   : > { %609 = vmatprep.subr.bf16.mxu1 %v909_v23  ;;  %p1035_p7 = scmp.lt.s32.totalorder %s1339_s9, %s1033_s7  ;;  %p1036_p9 = scmp.lt.s32.totalorder %s1034_s20, %s1028_s12 }
  0x80   : > { %p1031_p3 = pneg %p1030_p1 }
  0x81   : > { %p1037_p12 = por %p1036_p9, %p1035_p7 }
  0x82   : > { %610 = vmatpush1.bf16.msra.mxu1 %v911_v24 }
  0x83   : > { %611 = vmatprep.subr.bf16.mxu1 %v912_v25  ;;  %p1038_p2 = pnand %p1037_p12, %p1031_p3 }
  0x86   : > { %612 = vmatpush1.bf16.msra.mxu1 %v914_v26 }
  0x87   : > { %613 = vmatprep.subr.bf16.mxu1 %v915_v27 }
  0x8a   : > { %614 = vmatpush1.bf16.msra.mxu1 %v917_v28 }
  0x8b   : > { %615 = vmatprep.subr.bf16.mxu1 %v918_v29 }
  0x8e   : > { %616 = vmatpush1.bf16.msra.mxu1 %v920_v30 }
  0x8f   : > { %617 = vmatprep.subr.bf16.mxu1 %v921_v31 }
  0x92   : > { %618 = vmatpush1.bf16.msra.mxu1 %v923_v32 }
  0x93   : > { %619 = vmatprep.subr.bf16.mxu1 %v924_v33 }
  0x96   : > { %620 = vmatpush1.bf16.msra.mxu1 %v926_v34 }
  0x97   : > { %621 = vmatprep.subr.bf16.mxu1 %v927_v35 }
  0x9a   : > { %622 = vmatpush1.bf16.msra.mxu1 %v929_v36 }
  0x9b   : > { %623 = vmatprep.subr.bf16.mxu1 %v930_v37 }
  0x9e   : > { %624 = vmatpush1.bf16.msra.mxu1 %v932_v38 }
  0x9f   : > { %625 = vmatprep.subr.bf16.mxu1 %v933_v39 }
  0xa2   : > { %626 = vmatpush1.bf16.msra.mxu1 %v935_v40 }
  0xa3   : > { %627 = vmatprep.subr.bf16.mxu1 %v936_v41 }
  0xa6   : > { %628 = vmatpush1.bf16.msra.mxu1 %v938_v42 }
  0xa7   : > { %629 = vmatprep.subr.bf16.mxu1 %v939_v43 }
  0xaa   : > { %630 = vmatpush1.bf16.msra.mxu1 %v941_v44 }
 0x151   : > { %v384_v52 = vpop.f32.mrb[0].mxu0 }
 0x152   : > { %v385_v53 = vadd.f32 %v384_v52, %v289_v50  ;;  %v386_v54 = vpop.f32.mrb[1].mxu0 }
 0x153   : > { %v387_v55 = vadd.f32 %v386_v54, %v293_v51  ;;  %v388_v56 = vpop.f32.mrb[2].mxu0 }
 0x154   : > { %v391_v57 = vmax.f32 %v385_v53, 0.0  ;;  %v389_v58 = vpop.f32.mrb[3].mxu0 }
 0x155   : > { %v392_v59 = vmax.f32 %v387_v55, 0.0 }
 0x156   : > { %v393_v61 = vpack.c.bf16 %v391_v57, %v391_v57 }
 0x157   : > { %v394_v60 = vpack.c.bf16 %v392_v59, %v392_v59 }
 0x159   : > { %631 = vmatprep.mubr.bf16.mxu1 %v394_v60 }
 0x15a   : > { %632 = vmatmul.mubr.bf16.vlgmr.msra.gmra.mrb[0].mxu1 %v393_v61 }
 0x22d   : > { %v633_v1 = vpop.f32.mrb[0].mxu1 }
 0x22e   : > { %v634_v2 = vadd.f32 %v633_v1, %v432_v63  ;;  %v635_v3 = vpop.f32.mrb[1].mxu1 }
 0x22f   : > { %v636_v4 = vadd.f32 %v635_v3, %v436_v0  ;;  %v637_v5 = vpop.f32.mrb[2].mxu1 }
 0x230   : > { %v640_v6 = vmax.f32 %v634_v2, 0.0  ;;  %v638_v7 = vpop.f32.mrb[3].mxu1 }
 0x231   : > { %v641_v8 = vmax.f32 %v636_v4, 0.0 }
 0x232   : > { %642 = vst [vmem:[%s270_s10] sm:$0xff] %v640_v6 }
 0x233   : > { %643 = vst [vmem:[%s270_s10 + $0x8] sm:$0xff] %v641_v8 }
 0x234   : > { %1041 = shalt.err (!%p1038_p2)
}
 0x235   : > { %s1042_s15 = scalar_lea.hbm %s1337_s19, 256  ;;  %s1046_s11 = scalar_lea.hbm %s1387_s6, 512 }
 0x236   : > { %p1043_p13 = scmp.ne.s32.totalorder %s1337_s19, %s1042_s15  ;;  %p1047_p4 = scmp.lt.u32.totalorder %s1337_s19, %s1387_s6 }
 0x237   : > { %p1048_p5 = scmp.lt.u32.totalorder %s1046_s11, %s1042_s15  ;;  %p1050_p11 = scmp.lt.u32.totalorder %s1042_s15, %s1337_s19 }
 0x238   : > { %p1044_p6 = pnand %p1043_p13, %p1401_p0 }
 0x239   : > { %p1049_p8 = por %p1048_p5, %p1047_p4 }
 0x23a   : > { %p1045_p10 = pneg %p1044_p6 }
 0x23b   : > { %p1051_p1 = por %p1050_p11, %p1049_p8 }
 0x23d   : > { %p1052_p3 = pnand %p1051_p1, %p1045_p10 }
 0x23f   : > { %1055 = shalt.err (!%p1052_p3)
}
 0x240   : > { %819 = dma.vmem_to_hbm [thread:$0]  (%p1401_p0), %s1339_s9, 256, %s1337_s19, %s645_s24  }
 0x241 PF: > { %s671_s30 = sand.u32 1, %s1086_s0   ;;  %p1402_p7 = scmp.ne.s32.totalorder %s1392_s27, 0 }
 0x242   : > { %p1403_p9 = scmp.ge.s32.totalorder %s1098_s23, 2  ;;  %s672_s10 = scalar_lea.sflag [#allocation6], %s671_s30 }
 0x244   : > { %p833_p12 = pnand %p1403_p9, %p1402_p7 }
 0x246   : > { %1081 = dma.done.wait (!%p833_p12), %s672_s10, 256  }
 0x247   : > { %1083 = vsyncadd (!%p833_p12), %s672_s10, 4294967040  ;;  %p21_p2 = scmp.ge.s32.totalorder %s1252_s17, 4   ;;  %s1404_s0 = smov %s1090_s21 }
 0x248   : > { %s1405_s21 = smov %s1094_s22  ;;  %s1406_s22 = smov %s1268_s29 }
 0x249   : > { %s1407_s23 = smov %s1252_s17  ;;  %23 = sbr.rel (!%p21_p2) target bundleno = 6 (0x6), region = 93 }
 0x250   :  { %677 = vsyncpa [#allocation5], 1 }
 0x251   :  { %679 = vsyncpa [#allocation5 + $0x1], 1 }
 0x252   :  { %680 = vsyncpa [#allocation8], 1 }
 0x253   :  { %681 = vsyncpa [#allocation6], 1 }
 0x254   :  { %683 = vsyncpa [#allocation6 + $0x1], 1 }

</bundles_post_ra>
